<compile_context>
chip_gen: v5e
topology: v5e:2x2
jax: 0.10.0
libtpu: 0.0.40
codegen_flags: <defaults>
</compile_context>

<pallas_src>
import functools
import math

import jax
import jax.numpy as jnp
from jax import lax
from jax.experimental import pallas as pl
from jax.experimental.pallas import tpu as pltpu

_INV_SQRT2 = 1.0 / math.sqrt(2.0)


# ----------------------------- kernels -------------------------------------


def _gelu(h, approximate):
    if approximate:
        # tanh GELU -> EUP (separate VLIW slot); slight deviation from torch default.
        return jax.nn.gelu(h, approximate=True)
    # exact erf GELU == torch.nn.GELU() default
    return 0.5 * h * (1.0 + lax.erf(h * _INV_SQRT2))


def _mlp_kernel_direct(x_ref, w1_ref, b1_ref, w2_ref, b2_ref, o_ref, *, approx_gelu):
    """f32-output variant: accumulate straight into the resident output block."""
    j = pl.program_id(1)

    @pl.when(j == 0)
    def _init():
        o_ref[...] = jnp.zeros_like(o_ref)

    xb = x_ref[...].astype(w1_ref.dtype)          # in-kernel bf16 cast (hides under MXU)
    h = jnp.dot(xb, w1_ref[...], preferred_element_type=jnp.float32) + b1_ref[...]
    h = _gelu(h, approx_gelu)
    o_ref[...] += jnp.dot(h.astype(w2_ref.dtype), w2_ref[...],
                          preferred_element_type=jnp.float32)

    @pl.when(j == pl.num_programs(1) - 1)
    def _finalize():
        # dropout: p = 0.0 (eval semantics) -> identity.
        # TODO(synk): training-mode dropout (p > 0) via pltpu.prng_seed / prng_random_bits.
        o_ref[...] = o_ref[...] + b2_ref[...]


def _mlp_kernel_acc(x_ref, w1_ref, b1_ref, w2_ref, b2_ref, o_ref, acc_ref, *, approx_gelu):
    """General-output variant: f32 scratch accumulator, cast on finalize."""
    j = pl.program_id(1)

    @pl.when(j == 0)
    def _init():
        acc_ref[...] = jnp.zeros_like(acc_ref)

    xb = x_ref[...].astype(w1_ref.dtype)
    h = jnp.dot(xb, w1_ref[...], preferred_element_type=jnp.float32) + b1_ref[...]
    h = _gelu(h, approx_gelu)
    acc_ref[...] += jnp.dot(h.astype(w2_ref.dtype), w2_ref[...],
                            preferred_element_type=jnp.float32)

    @pl.when(j == pl.num_programs(1) - 1)
    def _finalize():
        o_ref[...] = (acc_ref[...] + b2_ref[...]).astype(o_ref.dtype)


# --------------------------- tiling / budgeting -----------------------------


def _round_up(x, m):
    return ((x + m - 1) // m) * m


def _h_tiles(H):
    """Multiples of 128 that divide H, descending (may be empty)."""
    return sorted((t for t in range(128, H + 1, 128) if H % t == 0), reverse=True)


def _tpu_budget_and_tm():
    """Per-generation VMEM budget (with headroom) and roofline-driven row-tile target."""
    kind = ""
    try:
        kind = jax.devices()[0].device_kind.lower()
    except Exception:
        pass
    vmem_phys = None
    try:
        vmem_phys = int(pltpu.get_tpu_info().vmem_capacity_bytes)
    except Exception:
        vmem_phys = None
    if vmem_phys is None:
        # conservative fallback: 64 MiB unless we positively know it's a pre-v7 chip
        vmem_phys = (128 << 20) if (kind and "v7" not in kind) else (64 << 20)
    budget = max(int(vmem_phys * 0.85), 32 << 20)   # headroom for Mosaic internal scratch
    # v5e roofline (~240 FLOP/byte) is satisfied at tm=512; v6e/v7x need ~650/620 -> tm=1024.
    older = any(s in kind for s in ("v2", "v3", "v4", "v5"))
    tm_target = 512 if older else 1024
    return budget, tm_target


def _vmem_estimate(tm, th, D, x_bytes, out_bytes, cb, direct_out):
    e = 2 * tm * D * x_bytes          # x tiles (double-buffered, native dtype)
    e += 2 * D * th * cb              # c_fc weight tiles
    e += 2 * th * D * cb              # c_proj weight tiles
    e += 2 * th * 4 + 2 * D * 4       # bias tiles (f32)
    e += 2 * tm * D * out_bytes       # output tiles
    if not direct_out:
        e += tm * D * 4               # f32 accumulator scratch
    e += tm * th * 4 + tm * th * cb   # f32 hidden activations + bf16 copy for 2nd matmul
    e += tm * D * cb                  # in-kernel bf16 cast of the x tile
    return int(e * 1.15) + (2 << 20)


def _choose_tiles(M, D, H, x_bytes, out_bytes, cb, budget, tm_target, direct_out):
    def est(tm, th):
        return _vmem_estimate(tm, th, D, x_bytes, out_bytes, cb, direct_out)

    tm0 = min(_round_up(tm_target, 8), _round_up(M, 8))

    # candidate row tiles, descending by halving
    tms, t = [], tm0
    while True:
        tms.append(t)
        if t <= 8:
            break
        nt = max(8, _round_up(t // 2, 8))
        if nt == t:
            break
        t = nt

    # 1) weights-resident fast path (th == H): weights DMA'd once -> MXU-bound.
    #    Don't shrink tm below 256 just to stay resident.
    for tm in tms:
        if tm < min(256, tm0):
            break
        if est(tm, H) <= budget:
            return tm, H
    # 2) streamed hidden dim: keep tm large (arithmetic intensity ~ tm FLOP/byte of
    #    streamed weights), shrink th first (v7x 64 MiB fit rule), then tm.
    hs = _h_tiles(H) or [H]
    for tm in tms:
        for th in hs:
            if est(tm, th) <= budget:
                return tm, th
    return tms[-1], hs[-1]


# ------------------------------- wrapper ------------------------------------


def prepare_mlp_params(w_fc, b_fc, w_proj, b_proj, compute_dtype=jnp.bfloat16):
    """One-time prep: transpose PyTorch (out, in) Linear weights to (in, out), cast to bf16."""
    w1 = jnp.asarray(w_fc).T.astype(compute_dtype)         # (D, 4D)
    w2 = jnp.asarray(w_proj).T.astype(compute_dtype)       # (4D, D)
    b1 = jnp.asarray(b_fc, jnp.float32).reshape(1, -1)     # (1, 4D)
    b2 = jnp.asarray(b_proj, jnp.float32).reshape(1, -1)   # (1, D)
    return w1, b1, w2, b2


def mlp_pallas(x, w1, b1, w2, b2, *, approx_gelu=False):
    """x: (B, T, D) in its native dtype. w1 (D, 4D), b1 (1, 4D), w2 (4D, D), b2 (1, D)."""
    B, T, D = x.shape
    H = w1.shape[1]
    compute_dtype = w1.dtype
    cb = jnp.dtype(compute_dtype).itemsize
    x_bytes = jnp.dtype(x.dtype).itemsize
    out_dtype = x.dtype
    out_bytes = jnp.dtype(out_dtype).itemsize
    direct_out = (jnp.dtype(out_dtype) == jnp.dtype(jnp.float32))
    M = B * T

    budget, tm_target = _tpu_budget_and_tm()
    tm_eff, th_eff = _choose_tiles(M, D, H, x_bytes, out_bytes, cb, budget,
                                   tm_target, direct_out)

    # With weights resident (single reduction step), splitting the row axis is free:
    # guarantee >= 2 row tiles so both v7x TensorCores get work.
    if th_eff == H and M > 8 and _round_up(M, tm_eff) // tm_eff < 2:
        half = _round_up((M + 1) // 2, 8)
        if half < tm_eff:
            tm_eff = half

    M_pad = _round_up(M, tm_eff)
    x2 = x.reshape(M, D)                       # no wrapper-side dtype cast
    if M_pad != M:
        x2 = jnp.pad(x2, ((0, M_pad - M), (0, 0)))

    n_m = M_pad // tm_eff
    n_h = H // th_eff

    est = _vmem_estimate(tm_eff, th_eff, D, x_bytes, out_bytes, cb, direct_out)
    vmem_limit = min(budget, max(int(est * 1.5), 32 << 20))

    kernel = functools.partial(
        _mlp_kernel_direct if direct_out else _mlp_kernel_acc, approx_gelu=approx_gelu)
    scratch = [] if direct_out else [pltpu.VMEM((tm_eff, D), jnp.float32)]

    out = pl.pallas_call(
        kernel,
        out_shape=jax.ShapeDtypeStruct((M_pad, D), out_dtype),
        grid_spec=pltpu.PrefetchScalarGridSpec(
            num_scalar_prefetch=0,
            grid=(n_m, n_h),                                      # reduction (H) axis last
            in_specs=[
                pl.BlockSpec((tm_eff, D), lambda i, j: (i, 0)),   # x rows (native dtype)
                pl.BlockSpec((D, th_eff), lambda i, j: (0, j)),   # c_fc weight tile
                pl.BlockSpec((1, th_eff), lambda i, j: (0, j)),   # c_fc bias tile
                pl.BlockSpec((th_eff, D), lambda i, j: (j, 0)),   # c_proj weight tile
                pl.BlockSpec((1, D), lambda i, j: (0, 0)),        # c_proj bias (resident)
            ],
            out_specs=pl.BlockSpec((tm_eff, D), lambda i, j: (i, 0)),
            scratch_shapes=scratch,
        ),
        compiler_params=pltpu.CompilerParams(
            dimension_semantics=("parallel", "arbitrary"),
            vmem_limit_bytes=vmem_limit),
    )(x2, w1, b1, w2, b2)

    if M_pad != M:
        out = out[:M]
    return out.reshape(B, T, D)


# ------------------------------ reference -----------------------------------


def mlp_ref(x, w_fc, b_fc, w_proj, b_proj, compute_dtype=jnp.bfloat16):
    """Matched-precision reference: bf16 MXU operands, f32 accumulation, f32 exact GELU."""
    B, T, D = x.shape
    x2 = x.reshape(-1, D).astype(compute_dtype)
    h = jnp.dot(x2, w_fc.T.astype(compute_dtype),
                preferred_element_type=jnp.float32) + b_fc
    h = 0.5 * h * (1.0 + lax.erf(h * _INV_SQRT2))
    y = jnp.dot(h.astype(compute_dtype), w_proj.T.astype(compute_dtype),
                preferred_element_type=jnp.float32) + b_proj
    return y.reshape(B, T, D).astype(x.dtype)


if __name__ == "__main__":
    # config: n_embd=32, bias=True, dropout=0.0; batch=2, seq=8
    B, T, D = 2, 8, 32
    H = 4 * D

    key = jax.random.PRNGKey(0)
    kx, kw1, kb1, kw2, kb2 = jax.random.split(key, 5)

    x = jax.random.normal(kx, (B, T, D), dtype=jnp.float32)
    # deterministic init mimicking nn.Linear default (uniform +/- 1/sqrt(fan_in))
    w_fc = jax.random.uniform(kw1, (H, D), jnp.float32, -1.0, 1.0) / math.sqrt(D)
    b_fc = jax.random.uniform(kb1, (H,), jnp.float32, -1.0, 1.0) / math.sqrt(D)
    w_proj = jax.random.uniform(kw2, (D, H), jnp.float32, -1.0, 1.0) / math.sqrt(H)
    b_proj = jax.random.uniform(kb2, (D,), jnp.float32, -1.0, 1.0) / math.sqrt(H)

    params = prepare_mlp_params(w_fc, b_fc, w_proj, b_proj)
    y = mlp_pallas(x, *params)
    jax.block_until_ready(y)

    y_ref = mlp_ref(x, w_fc, b_fc, w_proj, b_proj)
    assert y.shape == (B, T, D)
    assert jnp.allclose(y, y_ref, atol=2e-3, rtol=2e-3), "mismatch vs reference"

    print("KERNEL_OK")
</pallas_src>

<mosaic_0001>
module attributes {stable_mosaic.version = 11 : i64} {
  func.func @_mlp_kernel_direct(%arg0: i32, %arg1: i32, %arg2: memref<8x32xf32, #tpu.memory_space<vmem>>, %arg3: memref<32x128xbf16, #tpu.memory_space<vmem>>, %arg4: memref<1x128xf32, #tpu.memory_space<vmem>>, %arg5: memref<128x32xbf16, #tpu.memory_space<vmem>>, %arg6: memref<1x32xf32, #tpu.memory_space<vmem>>, %arg7: memref<8x32xf32, #tpu.memory_space<vmem>>) attributes {dimension_semantics = [#tpu.dimension_semantics<parallel>, #tpu.dimension_semantics<arbitrary>], iteration_bounds = array<i64: 2, 1>, scalar_prefetch = 0 : i64, scratch_operands = 0 : i64, tpu.core_type = #tpu.core_type<tc>, window_params = [{transform_indices = @transform_0, window_bounds = array<i64: 8, 32>}, {transform_indices = @transform_1, window_bounds = array<i64: 32, 128>}, {transform_indices = @transform_2, window_bounds = array<i64: 1, 128>}, {transform_indices = @transform_3, window_bounds = array<i64: 128, 32>}, {pipeline_mode = #tpu.pipeline_mode<synchronous>, transform_indices = @transform_4, window_bounds = array<i64: 1, 32>}, {transform_indices = @transform_5, window_bounds = array<i64: 8, 32>}]} {
    %c0_i32 = arith.constant 0 : i32
    %0 = arith.cmpi eq, %arg1, %c0_i32 : i32
    %1 = arith.extui %0 : i1 to i32
    %c0_i32_0 = arith.constant 0 : i32
    %2 = arith.cmpi ne, %1, %c0_i32_0 : i32
    scf.if %2 {
      %cst_18 = arith.constant 0.000000e+00 : f32
      %27 = vector.broadcast %cst_18 : f32 to vector<8x32xf32>
      %c0_19 = arith.constant 0 : index
      %c0_20 = arith.constant 0 : index
      %28 = vector.load %arg7[%c0_19, %c0_20] : memref<8x32xf32, #tpu.memory_space<vmem>>, vector<8x32xf32>
      tpu.vector_store %arg7[%c0_19, %c0_20], %27 {strides = array<i32>} : memref<8x32xf32, #tpu.memory_space<vmem>>, vector<8x32xf32>,
    } else {
    }
    %c0 = arith.constant 0 : index
    %c0_1 = arith.constant 0 : index
    %3 = vector.load %arg2[%c0, %c0_1] : memref<8x32xf32, #tpu.memory_space<vmem>>, vector<8x32xf32>
    %4 = arith.truncf %3 : vector<8x32xf32> to vector<8x32xbf16>
    %c0_2 = arith.constant 0 : index
    %c0_3 = arith.constant 0 : index
    %5 = vector.load %arg3[%c0_2, %c0_3] : memref<32x128xbf16, #tpu.memory_space<vmem>>, vector<32x128xbf16>
    %cst = arith.constant dense<0.000000e+00> : vector<8x128xf32>
    %6 = tpu.matmul %4, %5, %cst {dimension_numbers = #tpu.dot_dimension_numbers<[1], [0], [0], [1], [0, 0, 1, 1], [], []>} : vector<8x32xbf16>, vector<32x128xbf16>, vector<8x128xf32> -> vector<8x128xf32>
    %c0_4 = arith.constant 0 : index
    %c0_5 = arith.constant 0 : index
    %7 = vector.load %arg4[%c0_4, %c0_5] : memref<1x128xf32, #tpu.memory_space<vmem>>, vector<1x128xf32>
    %8 = vector.broadcast %7 : vector<1x128xf32> to vector<8x128xf32>
    %9 = arith.addf %6, %8 : vector<8x128xf32>
    %cst_6 = arith.constant 5.000000e-01 : f32
    %10 = vector.broadcast %cst_6 : f32 to vector<8x128xf32>
    %11 = arith.mulf %10, %9 : vector<8x128xf32>
    %cst_7 = arith.constant 0.707106769 : f32
    %12 = vector.broadcast %cst_7 : f32 to vector<8x128xf32>
    %13 = arith.mulf %9, %12 : vector<8x128xf32>
    %14 = math.erf %13 : vector<8x128xf32>
    %cst_8 = arith.constant 1.000000e+00 : f32
    %15 = vector.broadcast %cst_8 : f32 to vector<8x128xf32>
    %16 = arith.addf %15, %14 : vector<8x128xf32>
    %17 = arith.mulf %11, %16 : vector<8x128xf32>
    %c0_9 = arith.constant 0 : index
    %c0_10 = arith.constant 0 : index
    %18 = vector.load %arg7[%c0_9, %c0_10] : memref<8x32xf32, #tpu.memory_space<vmem>>, vector<8x32xf32>
    %19 = arith.truncf %17 : vector<8x128xf32> to vector<8x128xbf16>
    %c0_11 = arith.constant 0 : index
    %c0_12 = arith.constant 0 : index
    %20 = vector.load %arg5[%c0_11, %c0_12] : memref<128x32xbf16, #tpu.memory_space<vmem>>, vector<128x32xbf16>
    %cst_13 = arith.constant dense<0.000000e+00> : vector<8x32xf32>
    %21 = tpu.matmul %19, %20, %cst_13 {dimension_numbers = #tpu.dot_dimension_numbers<[1], [0], [0], [1], [0, 0, 1, 1], [], []>} : vector<8x128xbf16>, vector<128x32xbf16>, vector<8x32xf32> -> vector<8x32xf32>
    %22 = arith.addf %18, %21 : vector<8x32xf32>
    %c0_14 = arith.constant 0 : index
    %c0_15 = arith.constant 0 : index
    %23 = vector.load %arg7[%c0_14, %c0_15] : memref<8x32xf32, #tpu.memory_space<vmem>>, vector<8x32xf32>
    tpu.vector_store %arg7[%c0_14, %c0_15], %22 {strides = array<i32>} : memref<8x32xf32, #tpu.memory_space<vmem>>, vector<8x32xf32>,
    %c0_i32_16 = arith.constant 0 : i32
    %24 = arith.cmpi eq, %arg1, %c0_i32_16 : i32
    %25 = arith.extui %24 : i1 to i32
    %c0_i32_17 = arith.constant 0 : i32
    %26 = arith.cmpi ne, %25, %c0_i32_17 : i32
    scf.if %26 {
      %c0_18 = arith.constant 0 : index
      %c0_19 = arith.constant 0 : index
      %27 = vector.load %arg7[%c0_18, %c0_19] : memref<8x32xf32, #tpu.memory_space<vmem>>, vector<8x32xf32>
      %c0_20 = arith.constant 0 : index
      %c0_21 = arith.constant 0 : index
      %28 = vector.load %arg6[%c0_20, %c0_21] : memref<1x32xf32, #tpu.memory_space<vmem>>, vector<1x32xf32>
      %29 = vector.broadcast %28 : vector<1x32xf32> to vector<8x32xf32>
      %30 = arith.addf %27, %29 : vector<8x32xf32>
      %c0_22 = arith.constant 0 : index
      %c0_23 = arith.constant 0 : index
      %31 = vector.load %arg7[%c0_22, %c0_23] : memref<8x32xf32, #tpu.memory_space<vmem>>, vector<8x32xf32>
      tpu.vector_store %arg7[%c0_22, %c0_23], %30 {strides = array<i32>} : memref<8x32xf32, #tpu.memory_space<vmem>>, vector<8x32xf32>,
    } else {
    }
    return
  }
  func.func @transform_0(%arg0: i32, %arg1: i32) -> (i32, i32) {
    %c0_i32 = arith.constant 0 : i32
    %c0_i32_0 = arith.constant 0 : i32
    return %arg0, %c0_i32 : i32, i32
  }
  func.func @transform_1(%arg0: i32, %arg1: i32) -> (i32, i32) {
    %c0_i32 = arith.constant 0 : i32
    %c0_i32_0 = arith.constant 0 : i32
    return %c0_i32, %arg1 : i32, i32
  }
  func.func @transform_2(%arg0: i32, %arg1: i32) -> (i32, i32) {
    %c0_i32 = arith.constant 0 : i32
    %c0_i32_0 = arith.constant 0 : i32
    return %c0_i32, %arg1 : i32, i32
  }
  func.func @transform_3(%arg0: i32, %arg1: i32) -> (i32, i32) {
    %c0_i32 = arith.constant 0 : i32
    %c0_i32_0 = arith.constant 0 : i32
    return %arg1, %c0_i32 : i32, i32
  }
  func.func @transform_4(%arg0: i32, %arg1: i32) -> (i32, i32) {
    %c0_i32 = arith.constant 0 : i32
    %c0_i32_0 = arith.constant 0 : i32
    %c0_i32_1 = arith.constant 0 : i32
    return %c0_i32, %c0_i32_0 : i32, i32
  }
  func.func @transform_5(%arg0: i32, %arg1: i32) -> (i32, i32) {
    %c0_i32 = arith.constant 0 : i32
    %c0_i32_0 = arith.constant 0 : i32
    return %arg0, %c0_i32 : i32, i32
  }
}

</mosaic_0001>

<bundles_post_ra>
// kernel: tpu_custom_call.1
= control target key start
LH: loop header
LB: loop body
LE: loop exit
PB: predicated region body
PF: predicated region fallthrough
CT: control target
= control target key end

     0   :  { %10 = vsyncpa [#allocation3], 0  ;;  %s977_s0 = inlined_call_operand.vmem [shape: f32[16,32], index: 0, kind: input, shape index: {}]   ;;  %s978_s1 = inlined_call_operand.vmem [shape: bf16[32,128], index: 1, kind: input, shape index: {}]   ;;  %s979_s2 = inlined_call_operand.vmem [shape: f32[1,128], index: 2, kind: input, shape index: {}]   ;;  %s980_s3 = inlined_call_operand.vmem [shape: bf16[128,32], index: 3, kind: input, shape index: {}]   ;;  %s981_s4 = inlined_call_operand.vmem [shape: f32[1,32], index: 4, kind: input, shape index: {}]   ;;  %s982_s5 = inlined_call_operand.hbm [shape: f32[16,32], index: 5, kind: output, shape index: {}]  }
   0x1   :  { %12 = vsyncpa [#allocation3 + $0x1], 0  ;;  %s828_s18 = smov 0   ;;  %s830_s19 = smov 0  }
   0x2   :  { %s832_s20 = smov 0   ;;  %s834_s21 = smov 0  }
   0x3   :  { %s836_s22 = smov 0   ;;  %s838_s23 = smov 0  }
   0x4 LB: > { %s591_s24 = sadd.s32 4294967295, %s795_s23   ;;  %s592_s25 = sadd.s32 4294967294, %s795_s23   ;;  %s795_s23 = sphi %s838_s23, %s18_s23   ;;  %s791_s22 = sphi %s836_s22, %s989_s22   ;;  %s787_s21 = sphi %s834_s21, %s988_s21   ;;  %s783_s20 = sphi %s832_s20, %s987_s20   ;;  %s779_s19 = sphi %s830_s19, %s986_s19   ;;  %s775_s18 = sphi %s828_s18, %s985_s18  }
   0x5   : > { %s30_s26 = sadd.s32 1, %s791_s22  ;;  %s162_s27 = sadd.s32 1, %s783_s20 }
   0x6   : > { %p32_p0 = scmp.ge.s32.totalorder %s30_s26, 2  ;;  %p172_p1 = scmp.ne.s32.totalorder %s783_s20, %s779_s19 }
   0x7   : > { %p173_p2 = scmp.eq.s32.totalorder %s591_s24, 1  ;;  %p178_p3 = scmp.ne.s32.totalorder %s779_s19, %s775_s18 }
   0x8   : > { %s991_s26 = smov (%p32_p0, %s30_s26), 0  ;;  %p179_p5 = scmp.eq.s32.totalorder %s592_s25, 1 }
   0x9   : > { %p868_p4 = por %p173_p2, %p172_p1  ;;  %s159_s29 = ssub.s32 %s791_s22, %s991_s26 }
   0xa   : > { %p598_p6 = scmp.ge.s32.totalorder %s795_s23, 1  ;;  %p160_p7 = scmp.eq.s32.totalorder %s159_s29, 0 }
   0xb   : > { %p875_p8 = por %p179_p5, %p178_p3  ;;  %p229_p9 = scmp.lt.s32.totalorder %s795_s23, 3 }
   0xc   : > { %s881_s6 = scalar_select %p160_p7, %s783_s20, %s162_s27  }
   0xd   : > { %p230_p10 = pnand %p598_p6, %p229_p9 }
   0xe   : > { %p268_p11 = scmp.lt.s32.totalorder (!%p230_p10), %s787_s21, 1  ;;  %s265_s17 = sand.u32 (!%p230_p10), 1, %s779_s19  }
   0xf   : > { %233 = sbr.rel (%p230_p10) target bundleno = 350 (0x15e), region = 40  ;;  %s599_s27 = sshll.u32 (!%p230_p10), %s265_s17, 3 }
  0x10   : > { %s925_s29 = scalar_lea.vmem (!%p230_p10), [#allocation2], %s599_s27  ;;  %s644_s7 = sshll.u32 (!%p230_p10), %s787_s21, 3 }
  0x11   : > { %s477_s10 = scalar_lea.hbm (!%p230_p10), %s982_s5, %s644_s7  ;;  %s479_s13 = sshll.u32 (!%p230_p10), %s925_s29, 4  ;;  %s480_s13 = int_to_ptr.vmem [resolvable:$true] %s479_s13 }
  0x12   : > { %s481_s14 = sshll.u32 (!%p230_p10), %s477_s10, 4  ;;  %s737_s27 = scalar_lea.hbm (!%p230_p10), %s982_s5, 16  ;;  %s482_s14 = int_to_ptr.hbm [resolvable:$true] %s481_s14 }
  0x14   : > { %v648_v0 = vld [vmem:[%s978_s1 + $0x8] sm:$0xff]  ;;  %v647_v1 = vld [vmem:[%s978_s1] sm:$0xff]  ;;  %s269_s11 = scalar_select %p268_p11, %s787_s21, 1  ;;  %vm290_vm0 = vcmask 261120   ;;  %v656_v4 = vld [vmem:[%s980_s3 + $0x38] sm:$0xff]  ;;  %v797_v34 = vmov 0.0  }
  0x15   : > { %324 = vmatpush.bf16.msra.mxu0 %v648_v0  ;;  %441 = vmatpush.bf16.msra.mxu1 %v656_v4  ;;  %v655_v5 = vld [vmem:[%s980_s3 + $0x30] sm:$0xff]  ;;  %v713_v6 = vld [vmem:[%s979_s2] ss:$0 sm:$0xff]  ;;  %v654_v7 = vld [vmem:[%s980_s3 + $0x28] sm:$0xff]  ;;  %291 = vst.msk [vmem:[%s925_s29] sm:$0xff] %vm290_vm0, %v797_v34  ;;  %s467_s21 = scalar_lea.sflag [#allocation3], %s265_s17 }
  0x16   : > { %s600_s12 = sshll.u32 %s269_s11, 3  ;;  %v653_v10 = vld [vmem:[%s980_s3 + $0x20] sm:$0xff]  ;;  %v652_v13 = vld [vmem:[%s980_s3 + $0x18] sm:$0xff]  ;;  %v651_v17 = vld [vmem:[%s980_s3 + $0x10] sm:$0xff] }
  0x17   : > { %s271_s15 = scalar_lea.vmem %s977_s0, %s600_s12  ;;  %v650_v22 = vld [vmem:[%s980_s3 + $0x8] sm:$0xff]  ;;  %v649_v26 = vld [vmem:[%s980_s3] sm:$0xff] }
  0x18   : > { %v292_v2 = vld [vmem:[%s271_s15] sm:$0xff]  ;;  %s731_s15 = sshra.s32 %s482_s14, 4  ;;  %s732_s15 = int_to_ptr.hbm [resolvable:$true] %s731_s15 }
  0x19   : > { %325 = vmatpush.bf16.msra.mxu0 %v647_v1  ;;  %v293_v3 = vpack.c.bf16 %v292_v2, %v292_v2  ;;  %442 = vmatpush.bf16.msra.mxu1 %v655_v5  ;;  %v714_v60 = vld [vmem:[%s981_s4] ss:$0 sm:$0xff]  ;;  %s733_s16 = scalar_lea.hbm %s732_s15, 8  ;;  %p738_p1 = scmp.lt.s32.totalorder %s732_s15, %s982_s5 }
  0x1a   : > { %p734_p12 = scmp.ne.s32.totalorder %s732_s15, %s733_s16  ;;  %p739_p2 = scmp.lt.s32.totalorder %s737_s27, %s733_s16 }
  0x1c   : > { %609 = vmatmul.msk.bf16.vlgmr.msra.gmra.mxu0 %vm290_vm0, %v293_v3  ;;  %v375_v57 = vld [vmem:[%s925_s29] sm:$0xff]  ;;  %p735_p13 = pnand %p734_p12, %p868_p4  ;;  %p740_p3 = por %p739_p2, %p738_p1 }
  0x1d   : > { %443 = vmatpush.bf16.msra.mxu1 %v654_v7 }
  0x1e   : > { %p736_p0 = pneg %p735_p13 }
  0x20   : > { %p741_p5 = pnand %p740_p3, %p736_p0 }
  0x21   : > { %444 = vmatpush.bf16.msra.mxu1 %v653_v10 }
  0x25   : > { %445 = vmatpush.bf16.msra.mxu1 %v652_v13 }
  0x29   : > { %446 = vmatpush.bf16.msra.mxu1 %v651_v17 }
  0x2d   : > { %447 = vmatpush.bf16.msra.mxu1 %v650_v22 }
  0x31   : > { %448 = vmatpush.bf16.msra.mxu1 %v649_v26 }
  0x99   : > { %v327_v8 = vpop.f32.mrf.mxu0 }
  0x9a   : > { %v328_v9 = vadd.f32 %v713_v6, %v327_v8 }
  0x9c   : > { %v332_v11 = vmul.f32 0.70710677, %v328_v9  ;;  %v331_v53 = vmul.f32 0.5, %v328_v9 }
  0x9e   : > { %v333_v12 = vmul.f32 %v332_v11, %v332_v11 }
  0xa0   : > { %v334_v14 = vmin.f32 %v333_v12, 16.0 }
  0xa1   : > { %v329_v15 = vpop.f32.mrf.mxu0 }
  0xa2   : > { %v335_v16 = vmul.f32 2.1237322e-06, %v334_v14  ;;  %v346_v18 = vmul.f32 3.8918573e-05, %v334_v14 }
  0xa4   : > { %v336_v19 = vadd.f32 0.00028619796, %v335_v16  ;;  %v347_v20 = vadd.f32 0.001143296, %v346_v18 }
  0xa6   : > { %v337_v21 = vmul.f32 %v336_v19, %v334_v14  ;;  %v348_v23 = vmul.f32 %v347_v20, %v334_v14 }
  0xa8   : > { %v349_v24 = vadd.f32 0.014752088, %v348_v23  ;;  %v338_v25 = vadd.f32 0.0036580483, %v337_v21 }
  0xaa   : > { %v350_v27 = vmul.f32 %v349_v24, %v334_v14  ;;  %v339_v29 = vmul.f32 %v338_v25, %v334_v14 }
  0xac   : > { %v351_v28 = vadd.f32 0.112945676, %v350_v27  ;;  %v340_v32 = vadd.f32 0.05243302, %v339_v29 }
  0xae   : > { %v352_v30 = vmul.f32 %v351_v28, %v334_v14  ;;  %v341_v36 = vmul.f32 %v340_v32, %v334_v14 }
  0xb0   : > { %v353_v31 = vadd.f32 0.4994258, %v352_v30  ;;  %v342_v37 = vadd.f32 0.18741608, %v341_v36 }
  0xb2   : > { %v354_v33 = vmul.f32 %v353_v31, %v334_v14  ;;  %v343_v39 = vmul.f32 %v342_v37, %v334_v14 }
  0xb4   : > { %v355_v35 = vadd.f32 1.0, %v354_v33  ;;  %v344_v43 = vadd.f32 1.1283791, %v343_v39 }
  0xb6   : > { %715 = vrcp.f32 %v355_v35  ;;  %v367_v42 = vand.u32 2147483648, %v355_v35  ;;  %v365_v45 = vand.u32 2147483647, %v355_v35  ;;  %vm361_vm2 = vweird.f32 %v355_v35 }
  0xb7   : > { %v345_v48 = vmul.f32 %v344_v43, %v332_v11 }
  0xb8   : > { %v368_v47 = vor.u32 1.1754944e-38, %v367_v42  ;;  %vm366_vm4 = vcmp.eq.f32.partialorder %v365_v45, 8.507059e+37 }
  0xbc   : > { %v716_v38 = vpop.eup %715 }
  0xbd   : > { %v357_v40 = vmul.f32 %v716_v38, %v355_v35  ;;  %vm362_vm1 = vweird.f32 %v716_v38 }
  0xbe   : > { %vm363_vm3 = vmor %vm361_vm2, %vm362_vm1 }
  0xbf   : > { %v358_v41 = vsub.f32 1.0, %v357_v40 }
  0xc1   : > { %v359_v44 = vmul.f32 %v716_v38, %v358_v41 }
  0xc3   : > { %v360_v46 = vadd.f32 %v716_v38, %v359_v44 }
  0xc5   : > { %v364_v49 = vsel %vm363_vm3, %v716_v38, %v360_v46 }
  0xc6   : > { %v369_v50 = vsel %vm366_vm4, %v368_v47, %v364_v49 }
  0xc7   : > { %v370_v51 = vmul.f32 %v369_v50, %v345_v48 }
  0xc9   : > { %v610_v52 = vclamps-f32 %v370_v51, 1.0 }
  0xcb   : > { %v373_v54 = vadd.f32 1.0, %v610_v52 }
  0xcd   : > { %v374_v55 = vmul.f32 %v373_v54, %v331_v53 }
  0xcf   : > { %v376_v56 = vpack.c.bf16 %v374_v55, %v374_v55 }
  0xd1   : > { %449 = vmatmul.bf16.vlgmr.msra.gmra.mxu1 %v376_v56 }
 0x14e   : > { %v450_v58 = vpop.f32.mrf.mxu1 }
 0x14f   : > { %v454_v59 = vadd.f32 %v450_v58, %v375_v57 }
 0x151   : > { %455 = vst.msk [vmem:[%s925_s29] sm:$0xff] %vm290_vm0, %v454_v59 }
 0x156   : > { %v452_v61 = vpop.f32.mrf.mxu1 }
 0x158   : > { %v459_v62 = vld [vmem:[%s925_s29] sm:$0xff] }
 0x159   : > { %v464_v63 = vadd.f32 %v714_v60, %v459_v62 }
 0x15b   : > { %465 = vst.msk [vmem:[%s925_s29] sm:$0xff] %vm290_vm0, %v464_v63 }
 0x15c   : > { %744 = shalt.err (!%p741_p5)
}
 0x15d   : > { %657 = dma.vmem_to_hbm [thread:$0]  (%p868_p4), %s480_s13, 128, %s482_s14, %s467_s21  }
 0x15e PF: > { %p663_p6 = scmp.ge.s32.totalorder %s795_s23, 2  ;;  %s493_s17 = sand.u32 1, %s775_s18  }
 0x15f   : > { %s494_s29 = scalar_lea.sflag [#allocation3], %s493_s17 }
 0x160   : > { %p660_p7 = pnand %p663_p6, %p875_p8 }
 0x162   : > { %p661_p9 = pneg %p660_p7 }
 0x164   : > { %770 = dma.done.wait (%p661_p9), %s494_s29, 128  }
 0x165   : > { %772 = vsyncadd (%p661_p9), %s494_s29, 4294967168  ;;  %s18_s23 = sadd.s32 1, %s795_s23   ;;  %s985_s18 = smov %s779_s19 }
 0x166   : > { %p15_p10 = scmp.ge.s32.totalorder %s18_s23, 4   ;;  %s986_s19 = smov %s783_s20 }
 0x167   : > { %s987_s20 = smov %s881_s6  ;;  %s988_s21 = smov %s791_s22 }
 0x168   : > { %s989_s22 = smov %s991_s26  ;;  %17 = sbr.rel (!%p15_p10) target bundleno = 4 (0x4), region = 92 }
 0x16d   :  { %500 = vsyncpa [#allocation3], 1 }
 0x16e   :  { %502 = vsyncpa [#allocation3 + $0x1], 1 }

</bundles_post_ra>
